<compile_context>
chip_gen: v5e
topology: v5e:2x2
jax: 0.10.0
libtpu: 0.0.40
codegen_flags: <defaults>
</compile_context>

<pallas_src>
import jax
import jax.numpy as jnp
from jax.experimental import pallas as pl
from jax.experimental.pallas import tpu as pltpu

EPS_MSG = 1e-7        # GENConv message eps
EPS_BN = 1e-5         # BatchNorm1d eps
EPS_SOFTMAX = 1e-16   # PyG softmax denominator clamp
LANE = 128
MASK_MM_DTYPE = jnp.bfloat16  # masks exact in bf16; f32 accumulation below


def _round_up(v, m=LANE):
    return ((v + m - 1) // m) * m


def _mm(a, b):
    """f32 MXU matmul (projections / MLP)."""
    return jnp.dot(a, b, preferred_element_type=jnp.float32)


def _mask_mm(mask, vals):
    """bf16 MXU matmul for the one-hot gather/scatter operators, f32 accumulate."""
    return jnp.dot(mask, vals.astype(MASK_MM_DTYPE),
                   preferred_element_type=jnp.float32)


def _genconv_block(h, e, src_oh, dst_oh_t, w1, b1, gamma, beta, w2, b2,
                   inv_n, apply_out_relu):
    """One GENConv given already-projected node (h) / edge (e) features."""
    xj = _mask_mm(src_oh, h)                                # [E, C] gather h[src]
    msg = jnp.maximum(xj + e, 0.0) + EPS_MSG                # [E, C]

    # Softmax aggregation (t=1) per destination, per channel. Shift by the
    # per-channel max over ALL edges: constant per channel => per-dst softmax
    # unchanged, exp overflow-safe.
    shift = jnp.max(msg, axis=0, keepdims=True)             # [1, C]
    num = jnp.exp(msg - shift)                              # [E, C]
    cat = jnp.concatenate([num, num * msg], axis=1)         # [E, 2C] fused num/den RHS
    red = _mask_mm(dst_oh_t, cat)                           # [N, 2C] single scatter matmul
    c = h.shape[1]
    den = red[:, :c]
    inv_den = pl.reciprocal(jnp.maximum(den, EPS_SOFTMAX), approx=True)  # EUP slot
    agg = red[:, c:] * inv_den                              # [N, C]
    out = agg + h                                           # + root (lin_src(x_dst))

    # MLP: Linear(C->2C) -> BatchNorm1d (training batch stats) -> ReLU -> Linear(2C->C)
    y1 = _mm(out, w1) + b1
    mu = jnp.sum(y1, axis=0, keepdims=True) * inv_n
    d = y1 - mu
    var = jnp.sum(d * d, axis=0, keepdims=True) * inv_n     # two-pass variance
    y1 = d * jax.lax.rsqrt(var + EPS_BN) * gamma + beta
    y1 = jnp.maximum(y1, 0.0)
    y = _mm(y1, w2) + b2
    if apply_out_relu:                                      # fused F.relu between convs
        y = jnp.maximum(y, 0.0)
    return y


def _make_kernel(dims, n_nodes):
    in_p, ed_p, c1, h1, c2, h2 = (dims[k] for k in ("in", "ed", "c1", "h1", "c2", "h2"))
    # Static row offsets into the packed weight slab (all multiples of 128 -> aligned).
    r_ws1 = 0
    r_we = r_ws1 + in_p
    r_w11 = r_we + ed_p
    r_w21 = r_w11 + c1
    r_ws2 = r_w21 + h1
    r_w12 = r_ws2 + c1
    r_w22 = r_w12 + c2
    inv_n = 1.0 / float(n_nodes)

    def kernel(x_ref, ea_ref, src_ref, dst_ref, w_ref, v_ref, out_ref):
        n = x_ref.shape[0]
        m = src_ref.shape[0]                                # number of edges

        # Gather/scatter operators built in-kernel from int32 indices (iota + compare).
        src_col = src_ref[...]                              # [E, 1] int32
        dst_row = dst_ref[...]                              # [1, E] int32
        col_ids = jax.lax.broadcasted_iota(jnp.int32, (m, n), 1)
        row_ids = jax.lax.broadcasted_iota(jnp.int32, (n, m), 0)
        src_oh = jnp.where(col_ids == src_col, 1.0, 0.0).astype(MASK_MM_DTYPE)   # [E, N]
        dst_oh_t = jnp.where(row_ids == dst_row, 1.0, 0.0).astype(MASK_MM_DTYPE)  # [N, E]

        x = x_ref[...]
        ea = ea_ref[...]

        # Weights: tile-aligned static slices of the packed slab (no full-slab vreg load).
        ws1 = w_ref[r_ws1:r_ws1 + in_p, :c1]
        we = w_ref[r_we:r_we + ed_p, :c1 + c2]              # fused [we1 | we2]
        w11 = w_ref[r_w11:r_w11 + c1, :h1]
        w21 = w_ref[r_w21:r_w21 + h1, :c1]
        ws2 = w_ref[r_ws2:r_ws2 + c1, :c2]
        w12 = w_ref[r_w12:r_w12 + c2, :h2]
        w22 = w_ref[r_w22:r_w22 + h2, :c2]

        # Vectors: one small slab load, sliced as values.
        v = v_ref[...]
        bs1 = v[0:1, :c1]
        be = v[1:2, :c1 + c2]
        b11 = v[2:3, :h1]
        g1 = v[3:4, :h1]
        bt1 = v[4:5, :h1]
        b21 = v[5:6, :c1]
        bs2 = v[6:7, :c2]
        b12 = v[7:8, :h2]
        g2 = v[8:9, :h2]
        bt2 = v[9:10, :h2]
        b22 = v[10:11, :c2]

        # Fused edge projection for BOTH layers: shared ea LHS, one MXU weight push.
        e_both = _mm(ea, we) + be                           # [E, C1+C2]
        e1 = e_both[:, :c1]
        e2 = e_both[:, c1:c1 + c2]

        # ----- conv1 + relu -----
        h_1 = _mm(x, ws1) + bs1
        y1 = _genconv_block(h_1, e1, src_oh, dst_oh_t, w11, b11, g1, bt1,
                            w21, b21, inv_n, apply_out_relu=True)

        # ----- conv2 (intermediate y1 never leaves the chip) -----
        h_2 = _mm(y1, ws2) + bs2
        y2 = _genconv_block(h_2, e2, src_oh, dst_oh_t, w12, b12, g2, bt2,
                            w22, b22, inv_n, apply_out_relu=False)
        out_ref[...] = y2

    return kernel


# ----------------------------- wrapper / padding ------------------------------

def _pad_mat(a, rows, cols):
    return jnp.pad(a, ((0, rows - a.shape[0]), (0, cols - a.shape[1])))


def _pad_vec(a, width):
    a = a.reshape(1, -1)
    return jnp.pad(a, ((0, 0), (0, width - a.shape[1])))


def _vmem_limit_bytes(footprint):
    floor = 32 * 1024 * 1024
    try:
        cap = int(pltpu.get_tpu_info().vmem_capacity_bytes)
    except Exception:
        cap = 64 * 1024 * 1024  # conservative (v7x per-TC) fallback
    return int(min(max(floor, int(footprint)), int(0.75 * cap)))


def init_genconv_params(key, in_ch, out_ch, edge_dim):
    ks = jax.random.split(key, 6)
    c = out_ch
    return {
        "w_src": jax.random.normal(ks[0], (in_ch, c), jnp.float32) * 0.1,
        "b_src": jnp.zeros((1, c), jnp.float32),
        "w_edge": jax.random.normal(ks[1], (edge_dim, c), jnp.float32) * 0.1,
        "b_edge": jnp.zeros((1, c), jnp.float32),
        "w1": jax.random.normal(ks[2], (c, 2 * c), jnp.float32) * 0.1,
        "b1": jnp.zeros((1, 2 * c), jnp.float32),
        "gamma": jnp.ones((1, 2 * c), jnp.float32),
        "beta": jnp.zeros((1, 2 * c), jnp.float32),
        "w2": jax.random.normal(ks[3], (2 * c, c), jnp.float32) * 0.1,
        "b2": jnp.zeros((1, c), jnp.float32),
    }


def gcn_forward(x, edge_index, edge_attr, params1, params2):
    n, in_ch = x.shape
    e_cnt, edge_dim = edge_attr.shape
    c1_real = params1["w_src"].shape[1]
    c2_real = params2["w_src"].shape[1]
    h1_real = params1["w1"].shape[1]
    h2_real = params2["w1"].shape[1]

    dims = {"in": _round_up(in_ch), "ed": _round_up(edge_dim),
            "c1": _round_up(c1_real), "h1": _round_up(h1_real),
            "c2": _round_up(c2_real), "h2": _round_up(h2_real)}
    in_p, ed_p, c1, h1, c2, h2 = (dims[k] for k in ("in", "ed", "c1", "h1", "c2", "h2"))

    # Lane-dense activations; int32 edge indices as tiny [E,1]/[1,E] vectors.
    x_p = _pad_mat(x, n, in_p)
    ea_p = _pad_mat(edge_attr, e_cnt, ed_p)
    src = edge_index[0].astype(jnp.int32).reshape(e_cnt, 1)
    dst = edge_index[1].astype(jnp.int32).reshape(1, e_cnt)

    ww = max(c1, c2, h1, h2, c1 + c2)   # common slab width (zero-padded cols are inert)

    # Packed weight slab (7 weight matrices -> 1 buffer); padded rows/cols are zero so
    # the padded-lane invariant (garbage in padded channels killed by zero weight rows)
    # is preserved.
    we_fused = jnp.concatenate([_pad_mat(params1["w_edge"], edge_dim, c1),
                                _pad_mat(params2["w_edge"], edge_dim, c2)], axis=1)
    w_slab = jnp.concatenate([
        _pad_mat(params1["w_src"], in_p, ww),
        _pad_mat(we_fused, ed_p, ww),
        _pad_mat(params1["w1"], c1, ww),
        _pad_mat(params1["w2"], h1, ww),
        _pad_mat(params2["w_src"], c1, ww),
        _pad_mat(params2["w1"], c2, ww),
        _pad_mat(params2["w2"], h2, ww),
    ], axis=0)

    # Packed bias/gamma/beta slab (11 vectors -> 1 buffer).
    be_fused = jnp.concatenate([_pad_vec(params1["b_edge"], c1),
                                _pad_vec(params2["b_edge"], c2)], axis=1)
    v_slab = jnp.concatenate([
        _pad_vec(params1["b_src"], ww),
        _pad_vec(be_fused, ww),
        _pad_vec(params1["b1"], ww),
        _pad_vec(params1["gamma"], ww),
        _pad_vec(params1["beta"], ww),
        _pad_vec(params1["b2"], ww),
        _pad_vec(params2["b_src"], ww),
        _pad_vec(params2["b1"], ww),
        _pad_vec(params2["gamma"], ww),
        _pad_vec(params2["beta"], ww),
        _pad_vec(params2["b2"], ww),
    ], axis=0)

    # VMEM budget from the actual padded footprint (masks + activations + params),
    # with 2x headroom for in-kernel temporaries, capped at 75% of physical VMEM.
    mask_bytes = 2 * e_cnt * n * (2 + 4)                     # bf16 masks + f32 build
    act_bytes = 4 * (n * (in_p + 2 * c1 + 2 * c2 + h1 + h2)
                     + e_cnt * (ed_p + 4 * c1 + 2 * c2))
    param_bytes = 4 * (w_slab.size + v_slab.size)
    vmem_limit = _vmem_limit_bytes(2 * (mask_bytes + act_bytes + param_bytes) + (8 << 20))

    args = (x_p, ea_p, src, dst, w_slab, v_slab)
    out_pad = pl.pallas_call(
        _make_kernel(dims, n),
        out_shape=jax.ShapeDtypeStruct((n, c2), jnp.float32),
        in_specs=[pl.BlockSpec(memory_space=pltpu.MemorySpace.VMEM)] * len(args),
        out_specs=pl.BlockSpec(memory_space=pltpu.MemorySpace.VMEM),
        compiler_params=pltpu.CompilerParams(vmem_limit_bytes=vmem_limit),
    )(*args)
    return out_pad[:, :c2_real]


if __name__ == "__main__":
    key = jax.random.PRNGKey(0)
    k_x, k_ea, k_ei, k_p1, k_p2 = jax.random.split(key, 5)

    # Small graph: N nodes, E directed edges.
    N, E = 16, 32
    in_channels, hidden_channels, out_channels, edge_dim = 8, 32, 16, 4

    x = jax.random.normal(k_x, (N, in_channels), jnp.float32)
    edge_attr = jax.random.normal(k_ea, (E, edge_dim), jnp.float32)
    edge_index = jax.random.randint(k_ei, (2, E), 0, N, dtype=jnp.int32)

    params1 = init_genconv_params(k_p1, in_channels, hidden_channels, edge_dim)
    params2 = init_genconv_params(k_p2, hidden_channels, out_channels, edge_dim)

    out = jax.jit(gcn_forward)(x, edge_index, edge_attr, params1, params2)
    jax.block_until_ready(out)
    assert out.shape == (N, out_channels) and out.dtype == jnp.float32
    assert bool(jnp.all(jnp.isfinite(out)))
    print("KERNEL_OK")
</pallas_src>

<mosaic_0001>
module attributes {stable_mosaic.version = 11 : i64} {
  func.func @kernel(%arg0: memref<16x128xf32, #tpu.memory_space<vmem>>, %arg1: memref<32x128xf32, #tpu.memory_space<vmem>>, %arg2: memref<32x1xi32, #tpu.memory_space<vmem>>, %arg3: memref<1x32xi32, #tpu.memory_space<vmem>>, %arg4: memref<896x256xf32, #tpu.memory_space<vmem>>, %arg5: memref<11x256xf32, #tpu.memory_space<vmem>>, %arg6: memref<16x128xf32, #tpu.memory_space<vmem>>) attributes {dimension_semantics = [], scalar_prefetch = 0 : i64, scratch_operands = 0 : i64, tpu.core_type = #tpu.core_type<tc>} {
    %c0 = arith.constant 0 : index
    %c0_0 = arith.constant 0 : index
    %0 = vector.load %arg2[%c0, %c0_0] : memref<32x1xi32, #tpu.memory_space<vmem>>, vector<32x1xi32>
    %c0_1 = arith.constant 0 : index
    %c0_2 = arith.constant 0 : index
    %1 = vector.load %arg3[%c0_1, %c0_2] : memref<1x32xi32, #tpu.memory_space<vmem>>, vector<1x32xi32>
    %2 = tpu.iota {dimensions = array<i32: 1>} : vector<32x16xi32>
    %3 = tpu.iota {dimensions = array<i32: 0>} : vector<16x32xi32>
    %4 = vector.broadcast %0 : vector<32x1xi32> to vector<32x16xi32>
    %5 = arith.cmpi eq, %2, %4 : vector<32x16xi32>
    %cst = arith.constant 1.000000e+00 : f32
    %cst_3 = arith.constant 0.000000e+00 : f32
    %6 = vector.broadcast %cst : f32 to vector<32x16xf32>
    %7 = vector.broadcast %cst_3 : f32 to vector<32x16xf32>
    %8 = arith.select %5, %6, %7 : vector<32x16xi1>, vector<32x16xf32>
    %9 = arith.truncf %8 : vector<32x16xf32> to vector<32x16xbf16>
    %10 = vector.broadcast %1 : vector<1x32xi32> to vector<16x32xi32>
    %11 = arith.cmpi eq, %3, %10 : vector<16x32xi32>
    %cst_4 = arith.constant 1.000000e+00 : f32
    %cst_5 = arith.constant 0.000000e+00 : f32
    %12 = vector.broadcast %cst_4 : f32 to vector<16x32xf32>
    %13 = vector.broadcast %cst_5 : f32 to vector<16x32xf32>
    %14 = arith.select %11, %12, %13 : vector<16x32xi1>, vector<16x32xf32>
    %15 = arith.truncf %14 : vector<16x32xf32> to vector<16x32xbf16>
    %c0_6 = arith.constant 0 : index
    %c0_7 = arith.constant 0 : index
    %16 = vector.load %arg0[%c0_6, %c0_7] : memref<16x128xf32, #tpu.memory_space<vmem>>, vector<16x128xf32>
    %c0_8 = arith.constant 0 : index
    %c0_9 = arith.constant 0 : index
    %17 = vector.load %arg1[%c0_8, %c0_9] : memref<32x128xf32, #tpu.memory_space<vmem>>, vector<32x128xf32>
    %c0_10 = arith.constant 0 : index
    %c0_11 = arith.constant 0 : index
    %18 = vector.load %arg4[%c0_10, %c0_11] : memref<896x256xf32, #tpu.memory_space<vmem>>, vector<128x128xf32>
    %c128 = arith.constant 128 : index
    %c0_12 = arith.constant 0 : index
    %19 = vector.load %arg4[%c128, %c0_12] : memref<896x256xf32, #tpu.memory_space<vmem>>, vector<128x256xf32>
    %c256 = arith.constant 256 : index
    %c0_13 = arith.constant 0 : index
    %20 = vector.load %arg4[%c256, %c0_13] : memref<896x256xf32, #tpu.memory_space<vmem>>, vector<128x128xf32>
    %c384 = arith.constant 384 : index
    %c0_14 = arith.constant 0 : index
    %21 = vector.load %arg4[%c384, %c0_14] : memref<896x256xf32, #tpu.memory_space<vmem>>, vector<128x128xf32>
    %c512 = arith.constant 512 : index
    %c0_15 = arith.constant 0 : index
    %22 = vector.load %arg4[%c512, %c0_15] : memref<896x256xf32, #tpu.memory_space<vmem>>, vector<128x128xf32>
    %c640 = arith.constant 640 : index
    %c0_16 = arith.constant 0 : index
    %23 = vector.load %arg4[%c640, %c0_16] : memref<896x256xf32, #tpu.memory_space<vmem>>, vector<128x128xf32>
    %c768 = arith.constant 768 : index
    %c0_17 = arith.constant 0 : index
    %24 = vector.load %arg4[%c768, %c0_17] : memref<896x256xf32, #tpu.memory_space<vmem>>, vector<128x128xf32>
    %c0_18 = arith.constant 0 : index
    %c0_19 = arith.constant 0 : index
    %25 = vector.load %arg5[%c0_18, %c0_19] : memref<11x256xf32, #tpu.memory_space<vmem>>, vector<11x256xf32>
    %26 = vector.extract_strided_slice %25 {offsets = [0, 0], sizes = [1, 128], strides = [1, 1]} : vector<11x256xf32> to vector<1x128xf32>
    %27 = vector.extract_strided_slice %25 {offsets = [1, 0], sizes = [1, 256], strides = [1, 1]} : vector<11x256xf32> to vector<1x256xf32>
    %28 = vector.extract_strided_slice %25 {offsets = [2, 0], sizes = [1, 128], strides = [1, 1]} : vector<11x256xf32> to vector<1x128xf32>
    %29 = vector.extract_strided_slice %25 {offsets = [3, 0], sizes = [1, 128], strides = [1, 1]} : vector<11x256xf32> to vector<1x128xf32>
    %30 = vector.extract_strided_slice %25 {offsets = [4, 0], sizes = [1, 128], strides = [1, 1]} : vector<11x256xf32> to vector<1x128xf32>
    %31 = vector.extract_strided_slice %25 {offsets = [5, 0], sizes = [1, 128], strides = [1, 1]} : vector<11x256xf32> to vector<1x128xf32>
    %32 = vector.extract_strided_slice %25 {offsets = [6, 0], sizes = [1, 128], strides = [1, 1]} : vector<11x256xf32> to vector<1x128xf32>
    %33 = vector.extract_strided_slice %25 {offsets = [7, 0], sizes = [1, 128], strides = [1, 1]} : vector<11x256xf32> to vector<1x128xf32>
    %34 = vector.extract_strided_slice %25 {offsets = [8, 0], sizes = [1, 128], strides = [1, 1]} : vector<11x256xf32> to vector<1x128xf32>
    %35 = vector.extract_strided_slice %25 {offsets = [9, 0], sizes = [1, 128], strides = [1, 1]} : vector<11x256xf32> to vector<1x128xf32>
    %36 = vector.extract_strided_slice %25 {offsets = [10, 0], sizes = [1, 128], strides = [1, 1]} : vector<11x256xf32> to vector<1x128xf32>
    %cst_20 = arith.constant dense<0.000000e+00> : vector<32x256xf32>
    %37 = tpu.matmul %17, %19, %cst_20 {dimension_numbers = #tpu.dot_dimension_numbers<[1], [0], [0], [1], [0, 0, 1, 1], [], []>} : vector<32x128xf32>, vector<128x256xf32>, vector<32x256xf32> -> vector<32x256xf32>
    %38 = vector.broadcast %27 : vector<1x256xf32> to vector<32x256xf32>
    %39 = arith.addf %37, %38 : vector<32x256xf32>
    %40 = vector.extract_strided_slice %39 {offsets = [0, 0], sizes = [32, 128], strides = [1, 1]} : vector<32x256xf32> to vector<32x128xf32>
    %41 = vector.extract_strided_slice %39 {offsets = [0, 128], sizes = [32, 128], strides = [1, 1]} : vector<32x256xf32> to vector<32x128xf32>
    %cst_21 = arith.constant dense<0.000000e+00> : vector<16x128xf32>
    %42 = tpu.matmul %16, %18, %cst_21 {dimension_numbers = #tpu.dot_dimension_numbers<[1], [0], [0], [1], [0, 0, 1, 1], [], []>} : vector<16x128xf32>, vector<128x128xf32>, vector<16x128xf32> -> vector<16x128xf32>
    %43 = vector.broadcast %26 : vector<1x128xf32> to vector<16x128xf32>
    %44 = arith.addf %42, %43 : vector<16x128xf32>
    %45 = arith.truncf %44 : vector<16x128xf32> to vector<16x128xbf16>
    %cst_22 = arith.constant dense<0.000000e+00> : vector<32x128xf32>
    %46 = tpu.matmul %9, %45, %cst_22 {dimension_numbers = #tpu.dot_dimension_numbers<[1], [0], [0], [1], [0, 0, 1, 1], [], []>} : vector<32x16xbf16>, vector<16x128xbf16>, vector<32x128xf32> -> vector<32x128xf32>
    %47 = arith.addf %46, %40 : vector<32x128xf32>
    %cst_23 = arith.constant 0.000000e+00 : f32
    %48 = vector.broadcast %cst_23 : f32 to vector<32x128xf32>
    %49 = arith.maximumf %47, %48 : vector<32x128xf32>
    %cst_24 = arith.constant 1.000000e-07 : f32
    %50 = vector.broadcast %cst_24 : f32 to vector<32x128xf32>
    %51 = arith.addf %49, %50 : vector<32x128xf32>
    %cst_25 = arith.constant dense<0xFF800000> : vector<128xf32>
    %52 = vector.multi_reduction <maximumf>, %51, %cst_25 [0] : vector<32x128xf32> to vector<128xf32>
    %53 = vector.shape_cast %52 : vector<128xf32> to vector<1x128xf32>
    %54 = vector.broadcast %53 : vector<1x128xf32> to vector<32x128xf32>
    %55 = arith.subf %51, %54 : vector<32x128xf32>
    %56 = math.exp %55 : vector<32x128xf32>
    %57 = arith.mulf %56, %51 : vector<32x128xf32>
    %58 = tpu.concatenate %56, %57 in 1 : vector<32x128xf32>, vector<32x128xf32> -> vector<32x256xf32>
    %59 = arith.truncf %58 : vector<32x256xf32> to vector<32x256xbf16>
    %cst_26 = arith.constant dense<0.000000e+00> : vector<16x256xf32>
    %60 = tpu.matmul %15, %59, %cst_26 {dimension_numbers = #tpu.dot_dimension_numbers<[1], [0], [0], [1], [0, 0, 1, 1], [], []>} : vector<16x32xbf16>, vector<32x256xbf16>, vector<16x256xf32> -> vector<16x256xf32>
    %61 = vector.extract_strided_slice %60 {offsets = [0, 0], sizes = [16, 128], strides = [1, 1]} : vector<16x256xf32> to vector<16x128xf32>
    %cst_27 = arith.constant 1.000000e-16 : f32
    %62 = vector.broadcast %cst_27 : f32 to vector<16x128xf32>
    %63 = arith.maximumf %61, %62 : vector<16x128xf32>
    %64 = tpu.reciprocal %63 {approx = true} : vector<16x128xf32> -> vector<16x128xf32>
    %65 = vector.extract_strided_slice %60 {offsets = [0, 128], sizes = [16, 128], strides = [1, 1]} : vector<16x256xf32> to vector<16x128xf32>
    %66 = arith.mulf %65, %64 : vector<16x128xf32>
    %67 = arith.addf %66, %44 : vector<16x128xf32>
    %cst_28 = arith.constant dense<0.000000e+00> : vector<16x128xf32>
    %68 = tpu.matmul %67, %20, %cst_28 {dimension_numbers = #tpu.dot_dimension_numbers<[1], [0], [0], [1], [0, 0, 1, 1], [], []>} : vector<16x128xf32>, vector<128x128xf32>, vector<16x128xf32> -> vector<16x128xf32>
    %69 = vector.broadcast %28 : vector<1x128xf32> to vector<16x128xf32>
    %70 = arith.addf %68, %69 : vector<16x128xf32>
    %cst_29 = arith.constant dense<0.000000e+00> : vector<128xf32>
    %71 = vector.multi_reduction <add>, %70, %cst_29 [0] : vector<16x128xf32> to vector<128xf32>
    %72 = vector.shape_cast %71 : vector<128xf32> to vector<1x128xf32>
    %cst_30 = arith.constant 6.250000e-02 : f32
    %73 = vector.broadcast %cst_30 : f32 to vector<1x128xf32>
    %74 = arith.mulf %72, %73 : vector<1x128xf32>
    %75 = vector.broadcast %74 : vector<1x128xf32> to vector<16x128xf32>
    %76 = arith.subf %70, %75 : vector<16x128xf32>
    %77 = arith.mulf %76, %76 : vector<16x128xf32>
    %cst_31 = arith.constant dense<0.000000e+00> : vector<128xf32>
    %78 = vector.multi_reduction <add>, %77, %cst_31 [0] : vector<16x128xf32> to vector<128xf32>
    %79 = vector.shape_cast %78 : vector<128xf32> to vector<1x128xf32>
    %cst_32 = arith.constant 6.250000e-02 : f32
    %80 = vector.broadcast %cst_32 : f32 to vector<1x128xf32>
    %81 = arith.mulf %79, %80 : vector<1x128xf32>
    %cst_33 = arith.constant 9.99999974E-6 : f32
    %82 = vector.broadcast %cst_33 : f32 to vector<1x128xf32>
    %83 = arith.addf %81, %82 : vector<1x128xf32>
    %84 = math.rsqrt %83 : vector<1x128xf32>
    %85 = vector.broadcast %84 : vector<1x128xf32> to vector<16x128xf32>
    %86 = arith.mulf %76, %85 : vector<16x128xf32>
    %87 = vector.broadcast %29 : vector<1x128xf32> to vector<16x128xf32>
    %88 = arith.mulf %86, %87 : vector<16x128xf32>
    %89 = vector.broadcast %30 : vector<1x128xf32> to vector<16x128xf32>
    %90 = arith.addf %88, %89 : vector<16x128xf32>
    %cst_34 = arith.constant 0.000000e+00 : f32
    %91 = vector.broadcast %cst_34 : f32 to vector<16x128xf32>
    %92 = arith.maximumf %90, %91 : vector<16x128xf32>
    %cst_35 = arith.constant dense<0.000000e+00> : vector<16x128xf32>
    %93 = tpu.matmul %92, %21, %cst_35 {dimension_numbers = #tpu.dot_dimension_numbers<[1], [0], [0], [1], [0, 0, 1, 1], [], []>} : vector<16x128xf32>, vector<128x128xf32>, vector<16x128xf32> -> vector<16x128xf32>
    %94 = vector.broadcast %31 : vector<1x128xf32> to vector<16x128xf32>
    %95 = arith.addf %93, %94 : vector<16x128xf32>
    %cst_36 = arith.constant 0.000000e+00 : f32
    %96 = vector.broadcast %cst_36 : f32 to vector<16x128xf32>
    %97 = arith.maximumf %95, %96 : vector<16x128xf32>
    %cst_37 = arith.constant dense<0.000000e+00> : vector<16x128xf32>
    %98 = tpu.matmul %97, %22, %cst_37 {dimension_numbers = #tpu.dot_dimension_numbers<[1], [0], [0], [1], [0, 0, 1, 1], [], []>} : vector<16x128xf32>, vector<128x128xf32>, vector<16x128xf32> -> vector<16x128xf32>
    %99 = vector.broadcast %32 : vector<1x128xf32> to vector<16x128xf32>
    %100 = arith.addf %98, %99 : vector<16x128xf32>
    %101 = arith.truncf %100 : vector<16x128xf32> to vector<16x128xbf16>
    %cst_38 = arith.constant dense<0.000000e+00> : vector<32x128xf32>
    %102 = tpu.matmul %9, %101, %cst_38 {dimension_numbers = #tpu.dot_dimension_numbers<[1], [0], [0], [1], [0, 0, 1, 1], [], []>} : vector<32x16xbf16>, vector<16x128xbf16>, vector<32x128xf32> -> vector<32x128xf32>
    %103 = arith.addf %102, %41 : vector<32x128xf32>
    %cst_39 = arith.constant 0.000000e+00 : f32
    %104 = vector.broadcast %cst_39 : f32 to vector<32x128xf32>
    %105 = arith.maximumf %103, %104 : vector<32x128xf32>
    %cst_40 = arith.constant 1.000000e-07 : f32
    %106 = vector.broadcast %cst_40 : f32 to vector<32x128xf32>
    %107 = arith.addf %105, %106 : vector<32x128xf32>
    %cst_41 = arith.constant dense<0xFF800000> : vector<128xf32>
    %108 = vector.multi_reduction <maximumf>, %107, %cst_41 [0] : vector<32x128xf32> to vector<128xf32>
    %109 = vector.shape_cast %108 : vector<128xf32> to vector<1x128xf32>
    %110 = vector.broadcast %109 : vector<1x128xf32> to vector<32x128xf32>
    %111 = arith.subf %107, %110 : vector<32x128xf32>
    %112 = math.exp %111 : vector<32x128xf32>
    %113 = arith.mulf %112, %107 : vector<32x128xf32>
    %114 = tpu.concatenate %112, %113 in 1 : vector<32x128xf32>, vector<32x128xf32> -> vector<32x256xf32>
    %115 = arith.truncf %114 : vector<32x256xf32> to vector<32x256xbf16>
    %cst_42 = arith.constant dense<0.000000e+00> : vector<16x256xf32>
    %116 = tpu.matmul %15, %115, %cst_42 {dimension_numbers = #tpu.dot_dimension_numbers<[1], [0], [0], [1], [0, 0, 1, 1], [], []>} : vector<16x32xbf16>, vector<32x256xbf16>, vector<16x256xf32> -> vector<16x256xf32>
    %117 = vector.extract_strided_slice %116 {offsets = [0, 0], sizes = [16, 128], strides = [1, 1]} : vector<16x256xf32> to vector<16x128xf32>
    %cst_43 = arith.constant 1.000000e-16 : f32
    %118 = vector.broadcast %cst_43 : f32 to vector<16x128xf32>
    %119 = arith.maximumf %117, %118 : vector<16x128xf32>
    %120 = tpu.reciprocal %119 {approx = true} : vector<16x128xf32> -> vector<16x128xf32>
    %121 = vector.extract_strided_slice %116 {offsets = [0, 128], sizes = [16, 128], strides = [1, 1]} : vector<16x256xf32> to vector<16x128xf32>
    %122 = arith.mulf %121, %120 : vector<16x128xf32>
    %123 = arith.addf %122, %100 : vector<16x128xf32>
    %cst_44 = arith.constant dense<0.000000e+00> : vector<16x128xf32>
    %124 = tpu.matmul %123, %23, %cst_44 {dimension_numbers = #tpu.dot_dimension_numbers<[1], [0], [0], [1], [0, 0, 1, 1], [], []>} : vector<16x128xf32>, vector<128x128xf32>, vector<16x128xf32> -> vector<16x128xf32>
    %125 = vector.broadcast %33 : vector<1x128xf32> to vector<16x128xf32>
    %126 = arith.addf %124, %125 : vector<16x128xf32>
    %cst_45 = arith.constant dense<0.000000e+00> : vector<128xf32>
    %127 = vector.multi_reduction <add>, %126, %cst_45 [0] : vector<16x128xf32> to vector<128xf32>
    %128 = vector.shape_cast %127 : vector<128xf32> to vector<1x128xf32>
    %cst_46 = arith.constant 6.250000e-02 : f32
    %129 = vector.broadcast %cst_46 : f32 to vector<1x128xf32>
    %130 = arith.mulf %128, %129 : vector<1x128xf32>
    %131 = vector.broadcast %130 : vector<1x128xf32> to vector<16x128xf32>
    %132 = arith.subf %126, %131 : vector<16x128xf32>
    %133 = arith.mulf %132, %132 : vector<16x128xf32>
    %cst_47 = arith.constant dense<0.000000e+00> : vector<128xf32>
    %134 = vector.multi_reduction <add>, %133, %cst_47 [0] : vector<16x128xf32> to vector<128xf32>
    %135 = vector.shape_cast %134 : vector<128xf32> to vector<1x128xf32>
    %cst_48 = arith.constant 6.250000e-02 : f32
    %136 = vector.broadcast %cst_48 : f32 to vector<1x128xf32>
    %137 = arith.mulf %135, %136 : vector<1x128xf32>
    %cst_49 = arith.constant 9.99999974E-6 : f32
    %138 = vector.broadcast %cst_49 : f32 to vector<1x128xf32>
    %139 = arith.addf %137, %138 : vector<1x128xf32>
    %140 = math.rsqrt %139 : vector<1x128xf32>
    %141 = vector.broadcast %140 : vector<1x128xf32> to vector<16x128xf32>
    %142 = arith.mulf %132, %141 : vector<16x128xf32>
    %143 = vector.broadcast %34 : vector<1x128xf32> to vector<16x128xf32>
    %144 = arith.mulf %142, %143 : vector<16x128xf32>
    %145 = vector.broadcast %35 : vector<1x128xf32> to vector<16x128xf32>
    %146 = arith.addf %144, %145 : vector<16x128xf32>
    %cst_50 = arith.constant 0.000000e+00 : f32
    %147 = vector.broadcast %cst_50 : f32 to vector<16x128xf32>
    %148 = arith.maximumf %146, %147 : vector<16x128xf32>
    %cst_51 = arith.constant dense<0.000000e+00> : vector<16x128xf32>
    %149 = tpu.matmul %148, %24, %cst_51 {dimension_numbers = #tpu.dot_dimension_numbers<[1], [0], [0], [1], [0, 0, 1, 1], [], []>} : vector<16x128xf32>, vector<128x128xf32>, vector<16x128xf32> -> vector<16x128xf32>
    %150 = vector.broadcast %36 : vector<1x128xf32> to vector<16x128xf32>
    %151 = arith.addf %149, %150 : vector<16x128xf32>
    %c0_52 = arith.constant 0 : index
    %c0_53 = arith.constant 0 : index
    %152 = vector.load %arg6[%c0_52, %c0_53] : memref<16x128xf32, #tpu.memory_space<vmem>>, vector<16x128xf32>
    tpu.vector_store %arg6[%c0_52, %c0_53], %151 {strides = array<i32>} : memref<16x128xf32, #tpu.memory_space<vmem>>, vector<16x128xf32>,
    return
  }
}

</mosaic_0001>

<bundles_post_ra>
// kernel: gcn_forward.1
= control target key start
LH: loop header
LB: loop body
LE: loop exit
PB: predicated region body
PF: predicated region fallthrough
CT: control target
= control target key end

     0   :  { %s1316_s0 = inlined_call_operand.vmem [shape: f32[16,128], index: 0, kind: input, shape index: {}]   ;;  %s1317_s1 = inlined_call_operand.vmem [shape: f32[32,128], index: 1, kind: input, shape index: {}]   ;;  %s1318_s2 = inlined_call_operand.vmem [shape: s32[32,1], index: 2, kind: input, shape index: {}]   ;;  %s1319_s3 = inlined_call_operand.vmem [shape: s32[1,32], index: 3, kind: input, shape index: {}]   ;;  %s1320_s4 = inlined_call_operand.vmem [shape: f32[896,256], index: 4, kind: input, shape index: {}]   ;;  %s1321_s5 = inlined_call_operand.vmem [shape: f32[11,256], index: 5, kind: input, shape index: {}]   ;;  %s1322_s6 = inlined_call_operand.hbm [shape: f32[16,128], index: 6, kind: output, shape index: {}]  }
   0x1   :  { %v84_v0 = vld [vmem:[%s1320_s4 + $0xf0] sm:$0xff]  ;;  %v83_v1 = vld [vmem:[%s1320_s4 + $0xe0] sm:$0xff] }
   0x2   :  { %261 = vmatpush.msra.mxu2 %v84_v0  ;;  %v82_v2 = vld [vmem:[%s1320_s4 + $0xd0] sm:$0xff]  ;;  %v81_v3 = vld [vmem:[%s1320_s4 + $0xc0] sm:$0xff] }
   0x3   :  { %v80_v4 = vld [vmem:[%s1320_s4 + $0xb0] sm:$0xff] }
   0x4   :  { %262 = vmatpush.msra.mxu2 %v83_v1 }
   0x6   :  { %263 = vmatpush.msra.mxu2 %v82_v2 }
   0x7   :  { %11 = vsyncpa [#allocation3], 0  ;;  %v79_v5 = vld [vmem:[%s1320_s4 + $0xa0] sm:$0xff]  ;;  %v27_v7 = vld [vmem:[%s1318_s2 + $0x10] sm:$0xff]  ;;  %v775_v8 = vmov 0   ;;  %v30_v42 = vlaneseq  ;;  %v776_v53 = vmov 0.0  }
   0x8   :  { %264 = vmatpush.msra.mxu2 %v81_v3  ;;  %v25_v6 = vld [vmem:[%s1318_s2] sm:$0xff]  ;;  %718 = vset.pattern.permute.xlu0 %v775_v8  ;;  %v115_v9 = vld [vmem:[%s1320_s4 + $0x1f0] sm:$0xff]  ;;  %v26_v15 = vld [vmem:[%s1318_s2 + $0x8] sm:$0xff]  ;;  %vm285_vm2 = vcmask 130048   ;;  %vm348_vm7 = vcmask 261120   ;;  %s693_s10 = sshll.u32 %s1322_s6, 4  ;;  %s694_s10 = int_to_ptr.hbm [resolvable:$true] %s693_s10 }
   0x9   :  { %v78_v10 = vld [vmem:[%s1320_s4 + $0x90] sm:$0xff]  ;;  %36 = vperm.xlu0 %718, %v25_v6   ;;  %719 = vset.pattern.permute.xlu1 %v775_v8  ;;  %v113_v11 = vld [vmem:[%s1320_s4 + $0x1e0] sm:$0xff]  ;;  %v28_v18 = vld [vmem:[%s1318_s2 + $0x18] sm:$0xff]  ;;  %v31_v46 = vand.u32 127, %v30_v42  ;;  %s778_s11 = smov 128   ;;  %s779_s12 = smov 8  }
   0xa   :  { %265 = vmatpush.msra.mxu2 %v80_v4  ;;  %42 = vperm.xlu1 %719, %v27_v7   ;;  %v77_v12 = vld [vmem:[%s1320_s4 + $0x80] sm:$0xff]  ;;  %v111_v13 = vld [vmem:[%s1320_s4 + $0x1d0] sm:$0xff]  ;;  %v64_v26 = vld [vmem:[%s1316_s0 + $0x8] sm:$0xff] }
   0xb   :  { %202 = vmatpush.msra.mxu0 %v115_v9  ;;  %v76_v14 = vld [vmem:[%s1320_s4 + $0x70] sm:$0xff]  ;;  %v109_v16 = vld [vmem:[%s1320_s4 + $0x1c0] sm:$0xff]  ;;  %v938_v40 = vld [vmem:[%s1317_s1 + $0x8] sm:$0xff] }
   0xc   :  { %266 = vmatpush.msra.mxu2 %v79_v5  ;;  %v75_v17 = vld [vmem:[%s1320_s4 + $0x60] sm:$0xff]  ;;  %v74_v19 = vld [vmem:[%s1320_s4 + $0x50] sm:$0xff]  ;;  %v961_v52 = vld [vmem:[%s1317_s1 + $0x18] sm:$0xff] }
   0xd   :  { %203 = vmatpush.msra.mxu0 %v113_v11  ;;  %v73_v20 = vld [vmem:[%s1320_s4 + $0x40] sm:$0xff]  ;;  %v72_v21 = vld [vmem:[%s1320_s4 + $0x30] sm:$0xff] }
   0xe   :  { %267 = vmatpush.msra.mxu2 %v78_v10  ;;  %v71_v22 = vld [vmem:[%s1320_s4 + $0x20] sm:$0xff]  ;;  %v70_v23 = vld [vmem:[%s1320_s4 + $0x10] sm:$0xff] }
   0xf   :  { %204 = vmatpush.msra.mxu0 %v111_v13  ;;  %v69_v24 = vld [vmem:[%s1320_s4] sm:$0xff]  ;;  %v107_v27 = vld [vmem:[%s1320_s4 + $0x1b0] sm:$0xff] }
  0x10   :  { %268 = vmatpush.msra.mxu2 %v77_v12  ;;  %v63_v25 = vld [vmem:[%s1316_s0] sm:$0xff]  ;;  %v103_v29 = vld [vmem:[%s1320_s4 + $0x190] sm:$0xff] }
  0x11   :  { %39 = vperm.xlu0 %718, %v26_v15   ;;  %205 = vmatpush.msra.mxu0 %v109_v16  ;;  %v105_v28 = vld [vmem:[%s1320_s4 + $0x1a0] sm:$0xff]  ;;  %v99_v31 = vld [vmem:[%s1320_s4 + $0x170] sm:$0xff] }
  0x12   :  { %269 = vmatpush.msra.mxu2 %v76_v14  ;;  %45 = vperm.xlu1 %719, %v28_v18   ;;  %v101_v30 = vld [vmem:[%s1320_s4 + $0x180] sm:$0xff]  ;;  %v95_v33 = vld [vmem:[%s1320_s4 + $0x150] sm:$0xff] }
  0x13   :  { %206 = vmatpush.msra.mxu0 %v107_v27  ;;  %v97_v32 = vld [vmem:[%s1320_s4 + $0x160] sm:$0xff]  ;;  %v91_v35 = vld [vmem:[%s1320_s4 + $0x130] sm:$0xff] }
  0x14   :  { %270 = vmatpush.msra.mxu2 %v75_v17  ;;  %v93_v34 = vld [vmem:[%s1320_s4 + $0x140] sm:$0xff]  ;;  %v87_v37 = vld [vmem:[%s1320_s4 + $0x110] sm:$0xff] }
  0x15   :  { %207 = vmatpush.msra.mxu0 %v105_v28  ;;  %v89_v36 = vld [vmem:[%s1320_s4 + $0x120] sm:$0xff]  ;;  %v944_v44 = vld [vmem:[%s1317_s1 + $0x10] sm:$0xff] }
  0x16   :  { %271 = vmatpush.msra.mxu2 %v74_v19  ;;  %v85_v38 = vld [vmem:[%s1320_s4 + $0x100] sm:$0xff] }
  0x17   :  { %208 = vmatpush.msra.mxu0 %v103_v29  ;;  %v932_v39 = vld [vmem:[%s1317_s1] sm:$0xff]  ;;  %v132_v29 = vld [vmem:[%s1320_s4 + $0x2f0] sm:$0xff] }
  0x18   :  { %272 = vmatpush.msra.mxu2 %v73_v20  ;;  %v949_v45 = vld [vmem:[%s1321_s5] sm:$0xff] }
  0x19   :  { %209 = vmatpush.msra.mxu0 %v101_v30  ;;  %v260_v47 = vperm.slane %v949_v45, 0  ;;  %v200_v4 = vperm.slane %v949_v45, 1  ;;  %v131_v30 = vld [vmem:[%s1320_s4 + $0x2e0] sm:$0xff] }
  0x1a   :  { %273 = vmatpush.msra.mxu2 %v72_v21 }
  0x1b   :  { %210 = vmatpush.msra.mxu0 %v99_v31 }
  0x1c   :  { %274 = vmatpush.msra.mxu2 %v71_v22 }
  0x1d   :  { %211 = vmatpush.msra.mxu0 %v97_v32  ;;  %v130_v32 = vld [vmem:[%s1320_s4 + $0x2d0] sm:$0xff] }
  0x1e   :  { %275 = vmatpush.msra.mxu2 %v70_v23 }
  0x1f   :  { %212 = vmatpush.msra.mxu0 %v95_v33 }
  0x20   :  { %276 = vmatpush.msra.mxu2 %v69_v24 }
  0x21   :  { %277 = vmatmul.f32.vlgmr.msra.gmra.mxu2 %v63_v25  ;;  %213 = vmatpush.msra.mxu0 %v93_v34  ;;  %v129_v34 = vld [vmem:[%s1320_s4 + $0x2c0] sm:$0xff] }
  0x23   :  { %214 = vmatpush.msra.mxu0 %v91_v35 }
  0x25   :  { %215 = vmatpush.msra.mxu0 %v89_v36  ;;  %v128_v36 = vld [vmem:[%s1320_s4 + $0x2b0] sm:$0xff] }
  0x27   :  { %216 = vmatpush.msra.mxu0 %v87_v37 }
  0x29   :  { %280 = vmatmul.f32.gmra.mxu2 %v64_v26  ;;  %217 = vmatpush.msra.mxu0 %v85_v38  ;;  %v127_v38 = vld [vmem:[%s1320_s4 + $0x2a0] sm:$0xff] }
  0x2a   :  { %218 = vmatmul.f32.vlgmr.msra.gmra.mxu0 %v932_v39 }
  0x2b   :  { %389 = vmatpush.msrb.mxu0 %v132_v29 }
  0x2d   :  { %390 = vmatpush.msrb.mxu0 %v131_v30 }
  0x2f   :  { %391 = vmatpush.msrb.mxu0 %v130_v32  ;;  %v116_v32 = vld [vmem:[%s1320_s4 + $0x1f8] sm:$0xff] }
  0x30   :  { %231 = vmatpush.msra.mxu1 %v116_v32 }
  0x31   :  { %392 = vmatpush.msrb.mxu0 %v129_v34  ;;  %v108_v34 = vld [vmem:[%s1320_s4 + $0x1b8] sm:$0xff] }
  0x32   :  { %221 = vmatmul.f32.gmra.mxu0 %v938_v40 }
  0x33   :  { %393 = vmatpush.msrb.mxu0 %v128_v36  ;;  %v104_v36 = vld [vmem:[%s1320_s4 + $0x198] sm:$0xff] }
  0x35   :  { %394 = vmatpush.msrb.mxu0 %v127_v38  ;;  %v100_v38 = vld [vmem:[%s1320_s4 + $0x178] sm:$0xff] }
  0x3a   :  { %224 = vmatmul.f32.gmra.mxu0 %v944_v44 }
  0x42   :  { %227 = vmatmul.f32.gmra.mxu0 %v961_v52 }
  0x7b   :  { %v37_v41 = vpop.permute.xlu0 %36 }
  0x7c   :  { %vm47_vm0 = vcmp.eq.s32.totalorder %v31_v46, %v37_v41  ;;  %v43_v56 = vpop.permute.xlu1 %42 }
  0x7d   :  { %v51_v54 = vsel %vm47_vm0, 1.0, %v776_v53  ;;  %vm49_vm3 = vcmp.eq.s32.totalorder %v31_v46, %v43_v56 }
  0x7e   :  { %v53_v60 = vsel %vm49_vm3, 1.0, %v776_v53 }
  0x83   :  { %v40_v48 = vpop.permute.xlu0 %39 }
  0x84   :  { %vm48_vm1 = vcmp.eq.s32.totalorder %v31_v46, %v40_v48  ;;  %v46_v59 = vpop.permute.xlu1 %45  ;;  %v126_v48 = vld [vmem:[%s1320_s4 + $0x290] sm:$0xff] }
  0x85   :  { %v52_v55 = vsel %vm48_vm1, 1.0, %v776_v53  ;;  %vm50_vm4 = vcmp.eq.s32.totalorder %v31_v46, %v46_v59  ;;  %v125_v59 = vld [vmem:[%s1320_s4 + $0x280] sm:$0xff]  ;;  %395 = vmatpush.msrb.mxu0 %v126_v48  ;;  %v388_v48 = vperm.slane %v949_v45, 2 }
  0x86   :  { %v968_v58 = vpack.c.bf16 %v52_v55, %v51_v54  ;;  %v54_v61 = vsel %vm50_vm4, 1.0, %v776_v53 }
  0x87   :  { %v974_v62 = vpack.c.bf16 %v54_v61, %v53_v60  ;;  %v124_v60 = vld [vmem:[%s1320_s4 + $0x270] sm:$0xff]  ;;  %v720_v61 = vld [vmem:[%s1319_s3] ss:$0 sm:$0xff]  ;;  %396 = vmatpush.msrb.mxu0 %v125_v59  ;;  %v88_v59 = vld [vmem:[%s1320_s4 + $0x118] sm:$0xff] }
  0x89   :  { %397 = vmatpush.msrb.mxu0 %v124_v60 }
  0xa4   :  { %v278_v43 = vpop.f32.mrf.mxu2 }
  0xa5   :  { %v954_v50 = vadd.f32 %v278_v43, %v260_v47 }
  0xa7   :  { %v219_v63 = vpop.f32.mrf.mxu0 }
  0xa8   :  { %v220_v7 = vadd.f32 %v219_v63, %v200_v4 }
  0xac   :  { %v281_v49 = vpop.f32.mrf.mxu2 }
  0xad   :  { %v956_v51 = vadd.f32 %v281_v49, %v260_v47 }
  0xaf   :  { %v284_v57 = vpack.c.bf16 %v956_v51, %v954_v50  ;;  %v222_v0 = vpop.f32.mrf.mxu0 }
  0xb0   :  { %v223_v5 = vadd.f32 %v222_v0, %v200_v4 }
  0xb1   :  { %299 = vmatpush.bf16.msra.mxu3 %v284_v57  ;;  %v33_v57 = vshrl.u32 %v30_v42, 7 }
  0xb3   :  { %v34_v63 = vadd.s32 8, %v33_v57  ;;  %vm58_vm5 = vcmp.eq.s32.totalorder %v33_v57, %v720_v61 }
  0xb4   :  { %705 = vmatmul.msk.bf16.vlgmr.msra.gmra.mxu3 %vm285_vm2, %v968_v58 }
  0xb5   :  { %vm59_vm6 = vcmp.eq.s32.totalorder %v34_v63, %v720_v61  ;;  %v86_v61 = vld [vmem:[%s1320_s4 + $0x108] sm:$0xff] }
  0xb7   :  { %v225_v3 = vpop.f32.mrf.mxu0 }
  0xb8   :  { %v226_v8 = vadd.f32 %v225_v3, %v200_v4 }
  0xbf   :  { %v228_v9 = vpop.f32.mrf.mxu0 }
  0xc0   :  { %v229_v13 = vadd.f32 %v228_v9, %v200_v4 }
  0xc4   :  { %706 = vmatmul.msk.bf16.gmra.mxu3 %vm285_vm2, %v974_v62 }
 0x137   :  { %v301_v1 = vpop.f32.mrf.mxu3 }
 0x138   :  { %v302_v11 = vadd.f32 %v301_v1, %v220_v7 }
 0x13a   :  { %v311_v16 = vmax.f32 %v302_v11, 0.0 }
 0x13c   :  { %v315_v21 = vadd.f32 1e-07, %v311_v16  ;;  %v120_v16 = vld [vmem:[%s1320_s4 + $0x230] sm:$0xff] }
 0x13f   :  { %v303_v2 = vpop.f32.mrf.mxu3 }
 0x140   :  { %v304_v10 = vadd.f32 %v303_v2, %v223_v5 }
 0x142   :  { %v312_v14 = vmax.f32 %v304_v10, 0.0  ;;  %v61_v10 = vsel %vm59_vm6, 1.0, %v776_v53 }
 0x144   :  { %v316_v19 = vadd.f32 1e-07, %v312_v14  ;;  %v123_v14 = vld [vmem:[%s1320_s4 + $0x260] sm:$0xff] }
 0x145   :  { %398 = vmatpush.msrb.mxu0 %v123_v14 }
 0x146   :  { %v319_v24 = vmax.f32 %v315_v21, %v316_v19 }
 0x147   :  { %v306_v6 = vpop.f32.mrf.mxu3 }
 0x148   :  { %v307_v12 = vadd.f32 %v306_v6, %v226_v8  ;;  %v60_v6 = vsel %vm58_vm5, 1.0, %v776_v53  ;;  %v122_v53 = vld [vmem:[%s1320_s4 + $0x250] sm:$0xff] }
 0x149   :  { %399 = vmatpush.msrb.mxu0 %v122_v53 }
 0x14a   :  { %v313_v17 = vmax.f32 %v307_v12, 0.0  ;;  %v1012_v12 = vpack.c.bf16 %v61_v10, %v60_v6  ;;  %v144_v6 = vld [vmem:[%s1320_s4 + $0x3b0] sm:$0xff] }
 0x14b   :  { %v142_v10 = vld [vmem:[%s1320_s4 + $0x390] sm:$0xff] }
 0x14c   :  { %v317_v22 = vadd.f32 1e-07, %v313_v17  ;;  %v119_v17 = vld [vmem:[%s1320_s4 + $0x220] sm:$0xff] }
 0x14f   :  { %v308_v15 = vpop.f32.mrf.mxu3 }
 0x150   :  { %v309_v18 = vadd.f32 %v308_v15, %v229_v13  ;;  %v121_v15 = vld [vmem:[%s1320_s4 + $0x240] sm:$0xff] }
 0x151   :  { %400 = vmatpush.msrb.mxu0 %v121_v15  ;;  %v140_v15 = vld [vmem:[%s1320_s4 + $0x370] sm:$0xff] }
 0x152   :  { %v314_v20 = vmax.f32 %v309_v18, 0.0  ;;  %v118_v18 = vld [vmem:[%s1320_s4 + $0x210] sm:$0xff] }
 0x153   :  { %401 = vmatpush.msrb.mxu0 %v120_v16 }
 0x154   :  { %v318_v23 = vadd.f32 1e-07, %v314_v20 }
 0x155   :  { %402 = vmatpush.msrb.mxu0 %v119_v17  ;;  %v139_v17 = vld [vmem:[%s1320_s4 + $0x360] sm:$0xff] }
 0x156   :  { %v320_v25 = vmax.f32 %v317_v22, %v318_v23 }
 0x157   :  { %403 = vmatpush.msrb.mxu0 %v118_v18 }
 0x158   :  { %v321_v26 = vmax.f32 %v319_v24, %v320_v25 }
 0x15a   :  { %v322_v27 = vrot.slane %v321_v26, 4 }
 0x15c   :  { %v323_v28 = vmax.f32 %v321_v26, %v322_v27 }
 0x15e   :  { %v324_v31 = vrot.slane %v323_v28, 2 }
 0x160   :  { %v325_v33 = vmax.f32 %v323_v28, %v324_v31 }
 0x162   :  { %v326_v35 = vrot.slane %v325_v33, 1 }
 0x164   :  { %v327_v37 = vmax.f32 %v325_v33, %v326_v35  ;;  %v114_v33 = vld [vmem:[%s1320_s4 + $0x1e8] sm:$0xff] }
 0x165   :  { %232 = vmatpush.msra.mxu1 %v114_v33  ;;  %v106_v35 = vld [vmem:[%s1320_s4 + $0x1a8] sm:$0xff] }
 0x166   :  { %v331_v41 = vsub.f32 %v318_v23, %v327_v37  ;;  %v330_v43 = vsub.f32 %v317_v22, %v327_v37  ;;  %v328_v46 = vsub.f32 %v315_v21, %v327_v37  ;;  %v329_v47 = vsub.f32 %v316_v19, %v327_v37  ;;  %v102_v37 = vld [vmem:[%s1320_s4 + $0x188] sm:$0xff] }
 0x168   :  { %v338_v49 = vmul.f32 1.442695, %v331_v41  ;;  %v336_v54 = vmul.f32 1.442695, %v330_v43  ;;  %v332_v55 = vmul.f32 1.442695, %v328_v46 }
 0x169   :  { %v334_v56 = vmul.f32 1.442695, %v329_v47  ;;  %v98_v41 = vld [vmem:[%s1320_s4 + $0x168] sm:$0xff]  ;;  %v96_v46 = vld [vmem:[%s1320_s4 + $0x158] sm:$0xff] }
 0x16a   :  { %721 = vpow2.f32 %v338_v49  ;;  %v94_v47 = vld [vmem:[%s1320_s4 + $0x148] sm:$0xff]  ;;  %v92_v49 = vld [vmem:[%s1320_s4 + $0x138] sm:$0xff] }
 0x16b   :  { %723 = vpow2.f32 %v336_v54  ;;  %v90_v54 = vld [vmem:[%s1320_s4 + $0x128] sm:$0xff] }
 0x16c   :  { %725 = vpow2.f32 %v332_v55 }
 0x16d   :  { %727 = vpow2.f32 %v334_v56 }
 0x170   :  { %v722_v42 = vpop.eup %721 }
 0x171   :  { %v724_v0 = vpop.eup %723  ;;  %v343_v1 = vmul.f32 %v722_v42, %v318_v23 }
 0x172   :  { %v726_v2 = vpop.eup %725  ;;  %v346_v3 = vpack.c.bf16 %v722_v42, %v724_v0  ;;  %v342_v4 = vmul.f32 %v724_v0, %v317_v22  ;;  %v148_v42 = vld [vmem:[%s1320_s4 + $0x3f0] sm:$0xff] }
 0x173   :  { %v728_v5 = vpop.eup %727  ;;  %v340_v8 = vmul.f32 %v726_v2, %v315_v21 }
 0x174   :  { %358 = vmatpush.bf16.msrb.mxu3 %v346_v3  ;;  %v347_v7 = vpack.c.bf16 %v343_v1, %v342_v4  ;;  %v341_v9 = vmul.f32 %v728_v5, %v316_v19  ;;  %v344_v11 = vpack.c.bf16 %v728_v5, %v726_v2  ;;  %v117_v19 = vld [vmem:[%s1320_s4 + $0x200] sm:$0xff]  ;;  %v146_v3 = vld [vmem:[%s1320_s4 + $0x3d0] sm:$0xff] }
 0x175   :  { %404 = vmatpush.msrb.mxu0 %v117_v19  ;;  %v147_v1 = vld [vmem:[%s1320_s4 + $0x3e0] sm:$0xff]  ;;  %v138_v19 = vld [vmem:[%s1320_s4 + $0x350] sm:$0xff] }
 0x176   :  { %372 = vmatpush.bf16.msrb.mxu2 %v347_v7  ;;  %v345_v13 = vpack.c.bf16 %v341_v9, %v340_v8  ;;  %v143_v8 = vld [vmem:[%s1320_s4 + $0x3a0] sm:$0xff] }
 0x178   :  { %359 = vmatpush.bf16.msrb.mxu3 %v344_v11 }
 0x17a   :  { %373 = vmatpush.bf16.msrb.mxu2 %v345_v13 }
 0x17b   :  { %707 = vmatmul.msk.bf16.vlgmr.msrb.gmra.mxu3 %vm348_vm7, %v1012_v12 }
 0x17d   :  { %708 = vmatmul.msk.bf16.vlgmr.msrb.gmra.mxu2 %vm348_vm7, %v1012_v12 }
 0x1fe   :  { %v361_v20 = vpop.f32.mrf.mxu3 }
 0x1ff   :  { %v380_v21 = vmax.f32 %v361_v20, 1e-16 }
 0x200   :  { %v375_v22 = vpop.f32.mrf.mxu2 }
 0x201   :  { %729 = vrcp.f32 %v380_v21  ;;  %v136_v21 = vld [vmem:[%s1320_s4 + $0x330] sm:$0xff] }
 0x206   :  { %v363_v23 = vpop.f32.mrf.mxu3 }
 0x207   :  { %v730_v24 = vpop.eup %729  ;;  %v381_v25 = vmax.f32 %v363_v23, 1e-16  ;;  %v135_v23 = vld [vmem:[%s1320_s4 + $0x320] sm:$0xff] }
 0x208   :  { %v384_v26 = vmul.f32 %v730_v24, %v375_v22  ;;  %v377_v29 = vpop.f32.mrf.mxu2 }
 0x209   :  { %731 = vrcp.f32 %v381_v25  ;;  %v134_v25 = vld [vmem:[%s1320_s4 + $0x310] sm:$0xff] }
 0x20a   :  { %v386_v27 = vadd.f32 %v384_v26, %v954_v50  ;;  %v112_v50 = vld [vmem:[%s1320_s4 + $0x1d8] sm:$0xff] }
 0x20b   :  { %233 = vmatpush.msra.mxu1 %v112_v50 }
 0x20c   :  { %405 = vmatmul.f32.vlgmr.msrb.gmra.mxu0 %v386_v27  ;;  %v133_v27 = vld [vmem:[%s1320_s4 + $0x300] sm:$0xff] }
 0x20f   :  { %v732_v28 = vpop.eup %731 }
 0x210   :  { %v385_v30 = vmul.f32 %v732_v28, %v377_v29 }
 0x212   :  { %v387_v31 = vadd.f32 %v385_v30, %v956_v51  ;;  %v110_v51 = vld [vmem:[%s1320_s4 + $0x1c8] sm:$0xff] }
 0x213   :  { %234 = vmatpush.msra.mxu1 %v110_v51 }
 0x214   :  { %408 = vmatmul.f32.gmra.mxu0 %v387_v31 }
 0x215   :  { %235 = vmatpush.msra.mxu1 %v108_v34  ;;  %v445_v34 = vperm.slane %v949_v45, 3 }
 0x217   :  { %236 = vmatpush.msra.mxu1 %v106_v35 }
 0x219   :  { %237 = vmatpush.msra.mxu1 %v104_v36 }
 0x21b   :  { %238 = vmatpush.msra.mxu1 %v102_v37  ;;  %v448_v37 = vperm.slane %v949_v45, 4 }
 0x21d   :  { %239 = vmatpush.msra.mxu1 %v100_v38 }
 0x21f   :  { %240 = vmatpush.msra.mxu1 %v98_v41 }
 0x221   :  { %241 = vmatpush.msra.mxu1 %v96_v46 }
 0x223   :  { %242 = vmatpush.msra.mxu1 %v94_v47 }
 0x225   :  { %243 = vmatpush.msra.mxu1 %v92_v49 }
 0x227   :  { %244 = vmatpush.msra.mxu1 %v90_v54  ;;  %v164_v54 = vld [vmem:[%s1320_s4 + $0x4f0] sm:$0xff] }
 0x228   :  { %480 = vmatpush.msra.mxu3 %v164_v54 }
 0x229   :  { %245 = vmatpush.msra.mxu1 %v88_v59  ;;  %v160_v59 = vld [vmem:[%s1320_s4 + $0x4b0] sm:$0xff] }
 0x22b   :  { %246 = vmatpush.msra.mxu1 %v86_v61  ;;  %v158_v61 = vld [vmem:[%s1320_s4 + $0x490] sm:$0xff] }
 0x22c   :  { %247 = vmatmul.f32.vlgmr.msra.gmra.mxu1 %v932_v39  ;;  %v145_v39 = vld [vmem:[%s1320_s4 + $0x3c0] sm:$0xff] }
 0x22d   :  { %454 = vmatpush.msrb.mxu1 %v148_v42  ;;  %v156_v42 = vld [vmem:[%s1320_s4 + $0x470] sm:$0xff] }
 0x22f   :  { %455 = vmatpush.msrb.mxu1 %v147_v1  ;;  %v154_v1 = vld [vmem:[%s1320_s4 + $0x450] sm:$0xff] }
 0x231   :  { %456 = vmatpush.msrb.mxu1 %v146_v3  ;;  %v152_v3 = vld [vmem:[%s1320_s4 + $0x430] sm:$0xff] }
 0x233   :  { %457 = vmatpush.msrb.mxu1 %v145_v39  ;;  %v151_v39 = vld [vmem:[%s1320_s4 + $0x420] sm:$0xff] }
 0x234   :  { %250 = vmatmul.f32.gmra.mxu1 %v938_v40  ;;  %v141_v40 = vld [vmem:[%s1320_s4 + $0x380] sm:$0xff] }
 0x235   :  { %458 = vmatpush.msrb.mxu1 %v144_v6  ;;  %v150_v6 = vld [vmem:[%s1320_s4 + $0x410] sm:$0xff] }
 0x237   :  { %459 = vmatpush.msrb.mxu1 %v143_v8 }
 0x239   :  { %460 = vmatpush.msrb.mxu1 %v142_v10  ;;  %v453_v10 = vperm.slane %v949_v45, 5 }
 0x23b   :  { %461 = vmatpush.msrb.mxu1 %v141_v40 }
 0x23c   :  { %253 = vmatmul.f32.gmra.mxu1 %v944_v44  ;;  %v137_v44 = vld [vmem:[%s1320_s4 + $0x340] sm:$0xff] }
 0x23d   :  { %462 = vmatpush.msrb.mxu1 %v140_v15 }
 0x23f   :  { %463 = vmatpush.msrb.mxu1 %v139_v17  ;;  %v479_v17 = vperm.slane %v949_v45, 6 }
 0x241   :  { %464 = vmatpush.msrb.mxu1 %v138_v19 }
 0x243   :  { %465 = vmatpush.msrb.mxu1 %v137_v44 }
 0x244   :  { %256 = vmatmul.f32.gmra.mxu1 %v961_v52 }
 0x245   :  { %466 = vmatpush.msrb.mxu1 %v136_v21  ;;  %v198_v21 = vld [vmem:[%s1321_s5 + $0x8] sm:$0xff] }
 0x247   :  { %467 = vmatpush.msrb.mxu1 %v135_v23 }
 0x249   :  { %468 = vmatpush.msrb.mxu1 %v134_v25 }
 0x24b   :  { %469 = vmatpush.msrb.mxu1 %v133_v27 }
 0x289   :  { %v406_v43 = vpop.f32.mrf.mxu0 }
 0x28a   :  { %v407_v56 = vadd.f32 %v406_v43, %v388_v48 }
 0x291   :  { %v409_v55 = vpop.f32.mrf.mxu0 }
 0x292   :  { %v410_v57 = vadd.f32 %v409_v55, %v388_v48  ;;  %v163_v55 = vld [vmem:[%s1320_s4 + $0x4e0] sm:$0xff] }
 0x293   :  { %481 = vmatpush.msra.mxu3 %v163_v55  ;;  %v178_v55 = vld [vmem:[%s1320_s4 + $0x5d0] sm:$0xff] }
 0x294   :  { %v412_v60 = vadd.f32 %v410_v57, %v407_v56 }
 0x296   :  { %v413_v63 = vrot.slane %v412_v60, 4 }
 0x298   :  { %v414_v0 = vadd.f32 %v413_v63, %v412_v60  ;;  %v159_v60 = vld [vmem:[%s1320_s4 + $0x4a0] sm:$0xff] }
 0x299   :  { %v157_v63 = vld [vmem:[%s1320_s4 + $0x480] sm:$0xff] }
 0x29a   :  { %v415_v2 = vrot.slane %v414_v0, 2 }
 0x29c   :  { %v416_v4 = vadd.f32 %v415_v2, %v414_v0  ;;  %v155_v0 = vld [vmem:[%s1320_s4 + $0x460] sm:$0xff] }
 0x29d   :  { %v153_v2 = vld [vmem:[%s1320_s4 + $0x440] sm:$0xff] }
 0x29e   :  { %v417_v5 = vrot.slane %v416_v4, 1 }
 0x2a0   :  { %v418_v7 = vadd.f32 %v417_v5, %v416_v4 }
 0x2a2   :  { %v419_v9 = vmul.f32 0.0625, %v418_v7  ;;  %v149_v7 = vld [vmem:[%s1320_s4 + $0x400] sm:$0xff] }
 0x2a4   :  { %v420_v11 = vsub.f32 %v407_v56, %v419_v9  ;;  %v421_v13 = vsub.f32 %v410_v57, %v419_v9  ;;  %v162_v56 = vld [vmem:[%s1320_s4 + $0x4d0] sm:$0xff]  ;;  %v161_v57 = vld [vmem:[%s1320_s4 + $0x4c0] sm:$0xff] }
 0x2a5   :  { %482 = vmatpush.msra.mxu3 %v162_v56 }
 0x2a6   :  { %v422_v14 = vmul.f32 %v420_v11, %v420_v11  ;;  %v423_v53 = vmul.f32 %v421_v13, %v421_v13 }
 0x2a7   :  { %483 = vmatpush.msra.mxu3 %v161_v57  ;;  %v177_v57 = vld [vmem:[%s1320_s4 + $0x5c0] sm:$0xff] }
 0x2a8   :  { %v424_v16 = vadd.f32 %v423_v53, %v422_v14 }
 0x2a9   :  { %484 = vmatpush.msra.mxu3 %v160_v59  ;;  %v248_v4 = vpop.f32.mrf.mxu1 }
 0x2aa   :  { %v425_v18 = vrot.slane %v424_v16, 4 }
 0x2ab   :  { %485 = vmatpush.msra.mxu3 %v159_v60  ;;  %v176_v60 = vld [vmem:[%s1320_s4 + $0x5b0] sm:$0xff] }
 0x2ac   :  { %v426_v20 = vadd.f32 %v425_v18, %v424_v16 }
 0x2ad   :  { %486 = vmatpush.msra.mxu3 %v158_v61 }
 0x2ae   :  { %v427_v22 = vrot.slane %v426_v20, 2 }
 0x2af   :  { %487 = vmatpush.msra.mxu3 %v157_v63  ;;  %v175_v63 = vld [vmem:[%s1320_s4 + $0x5a0] sm:$0xff] }
 0x2b0   :  { %v428_v24 = vadd.f32 %v427_v22, %v426_v20  ;;  %v201_v22 = vperm.slane %v198_v21, 1  ;;  %v171_v21 = vld [vmem:[%s1320_s4 + $0x560] sm:$0xff] }
 0x2b1   :  { %488 = vmatpush.msra.mxu3 %v156_v42  ;;  %v251_v5 = vpop.f32.mrf.mxu1 }
 0x2b2   :  { %v429_v26 = vrot.slane %v428_v24, 1 }
 0x2b3   :  { %489 = vmatpush.msra.mxu3 %v155_v0 }
 0x2b4   :  { %v430_v28 = vadd.f32 %v429_v26, %v428_v24  ;;  %v249_v24 = vadd.f32 %v248_v4, %v201_v22  ;;  %v252_v26 = vadd.f32 %v251_v5, %v201_v22 }
 0x2b5   :  { %490 = vmatpush.msra.mxu3 %v154_v1 }
 0x2b6   :  { %v431_v52 = vmul.f32 0.0625, %v430_v28 }
 0x2b7   :  { %491 = vmatpush.msra.mxu3 %v153_v2 }
 0x2b8   :  { %v432_v29 = vadd.f32 1e-05, %v431_v52 }
 0x2b9   :  { %492 = vmatpush.msra.mxu3 %v152_v3  ;;  %v254_v8 = vpop.f32.mrf.mxu1  ;;  %v174_v3 = vld [vmem:[%s1320_s4 + $0x590] sm:$0xff] }
 0x2ba   :  { %733 = vrsqrt.f32 %v432_v29  ;;  %vm439_vm9 = vweird.f32 %v432_v29 }
 0x2bb   :  { %493 = vmatpush.msra.mxu3 %v151_v39 }
 0x2bd   :  { %494 = vmatpush.msra.mxu3 %v150_v6 }
 0x2bf   :  { %495 = vmatpush.msra.mxu3 %v149_v7  ;;  %v173_v7 = vld [vmem:[%s1320_s4 + $0x580] sm:$0xff] }
 0x2c0   :  { %v734_v30 = vpop.eup %733 }
 0x2c1   :  { %v434_v31 = vmul.f32 %v734_v30, %v432_v29  ;;  %vm440_vm8 = vweird.f32 %v734_v30  ;;  %v257_v9 = vpop.f32.mrf.mxu1 }
 0x2c2   :  { %vm441_vm10 = vmor %vm439_vm9, %vm440_vm8 }
 0x2c3   :  { %v435_v32 = vmul.f32 %v734_v30, %v434_v31 }
 0x2c5   :  { %v436_v33 = vmul.f32 0.5, %v435_v32 }
 0x2c7   :  { %v437_v50 = vsub.f32 1.5, %v436_v33  ;;  %v255_v33 = vadd.f32 %v254_v8, %v201_v22  ;;  %v172_v8 = vld [vmem:[%s1320_s4 + $0x570] sm:$0xff] }
 0x2c9   :  { %v438_v51 = vmul.f32 %v734_v30, %v437_v50 }
 0x2cb   :  { %v442_v35 = vsel %vm441_vm10, %v734_v30, %v438_v51 }
 0x2cc   :  { %v443_v36 = vmul.f32 %v442_v35, %v420_v11  ;;  %v444_v38 = vmul.f32 %v442_v35, %v421_v13 }
 0x2ce   :  { %v446_v41 = vmul.f32 %v445_v34, %v443_v36  ;;  %v447_v47 = vmul.f32 %v445_v34, %v444_v38 }
 0x2d0   :  { %v449_v43 = vadd.f32 %v448_v37, %v446_v41  ;;  %v450_v48 = vadd.f32 %v448_v37, %v447_v47 }
 0x2d2   :  { %v451_v46 = vmax.f32 %v449_v43, 0.0  ;;  %v452_v49 = vmax.f32 %v450_v48, 0.0  ;;  %v180_v48 = vld [vmem:[%s1320_s4 + $0x5f0] sm:$0xff] }
 0x2d4   :  { %470 = vmatmul.f32.vlgmr.msrb.gmra.mxu1 %v451_v46 }
 0x2dc   :  { %473 = vmatmul.f32.gmra.mxu1 %v452_v49  ;;  %v179_v49 = vld [vmem:[%s1320_s4 + $0x5e0] sm:$0xff] }
 0x351   :  { %v471_v11 = vpop.f32.mrf.mxu1 }
 0x352   :  { %v472_v13 = vadd.f32 %v471_v11, %v453_v10 }
 0x354   :  { %v477_v40 = vmax.f32 %v472_v13, 0.0 }
 0x356   :  { %496 = vmatmul.f32.vlgmr.msra.gmra.mxu3 %v477_v40 }
 0x359   :  { %v474_v14 = vpop.f32.mrf.mxu1 }
 0x35a   :  { %v475_v53 = vadd.f32 %v474_v14, %v453_v10 }
 0x35c   :  { %v478_v15 = vmax.f32 %v475_v53, 0.0 }
 0x35e   :  { %499 = vmatmul.f32.gmra.mxu3 %v478_v15 }
 0x3d9   :  { %v497_v16 = vpop.f32.mrf.mxu3 }
 0x3da   :  { %v1194_v19 = vadd.f32 %v497_v16, %v479_v17 }
 0x3e1   :  { %v500_v18 = vpop.f32.mrf.mxu3 }
 0x3e2   :  { %v1196_v20 = vadd.f32 %v500_v18, %v479_v17 }
 0x3e4   :  { %v503_v44 = vpack.c.bf16 %v1196_v20, %v1194_v19 }
 0x3e6   :  { %511 = vmatpush.bf16.msra.mxu2 %v503_v44 }
 0x3e9   :  { %709 = vmatmul.msk.bf16.vlgmr.msra.gmra.mxu2 %vm285_vm2, %v968_v58 }
 0x3ea   :  { %597 = vmatpush.msrb.mxu2 %v180_v48 }
 0x3ec   :  { %598 = vmatpush.msrb.mxu2 %v179_v49  ;;  %v193_v49 = vld [vmem:[%s1320_s4 + $0x6c0] sm:$0xff] }
 0x3ee   :  { %599 = vmatpush.msrb.mxu2 %v178_v55  ;;  %v192_v55 = vld [vmem:[%s1320_s4 + $0x6b0] sm:$0xff] }
 0x3f0   :  { %600 = vmatpush.msrb.mxu2 %v177_v57  ;;  %v191_v57 = vld [vmem:[%s1320_s4 + $0x6a0] sm:$0xff] }
 0x3f2   :  { %601 = vmatpush.msrb.mxu2 %v176_v60  ;;  %v190_v60 = vld [vmem:[%s1320_s4 + $0x690] sm:$0xff] }
 0x3f4   :  { %602 = vmatpush.msrb.mxu2 %v175_v63 }
 0x3f6   :  { %603 = vmatpush.msrb.mxu2 %v174_v3 }
 0x3f8   :  { %604 = vmatpush.msrb.mxu2 %v173_v7  ;;  %v185_v7 = vld [vmem:[%s1320_s4 + $0x640] sm:$0xff] }
 0x3f9   :  { %710 = vmatmul.msk.bf16.gmra.mxu2 %vm285_vm2, %v974_v62  ;;  %v258_v62 = vadd.f32 %v257_v9, %v201_v22  ;;  %v170_v22 = vld [vmem:[%s1320_s4 + $0x550] sm:$0xff] }
 0x3fa   :  { %605 = vmatpush.msrb.mxu2 %v172_v8 }
 0x3fc   :  { %606 = vmatpush.msrb.mxu2 %v171_v21 }
 0x3fe   :  { %607 = vmatpush.msrb.mxu2 %v170_v22  ;;  %v199_v22 = vld [vmem:[%s1321_s5 + $0x10] sm:$0x7] }
 0x46c   :  { %v513_v23 = vpop.f32.mrf.mxu2 }
 0x46d   :  { %v514_v25 = vadd.f32 %v513_v23, %v249_v24  ;;  %v169_v23 = vld [vmem:[%s1320_s4 + $0x540] sm:$0xff]  ;;  %v168_v24 = vld [vmem:[%s1320_s4 + $0x530] sm:$0xff] }
 0x46e   :  { %608 = vmatpush.msrb.mxu2 %v169_v23 }
 0x46f   :  { %v523_v28 = vmax.f32 %v514_v25, 0.0  ;;  %v166_v25 = vld [vmem:[%s1320_s4 + $0x510] sm:$0xff] }
 0x470   :  { %609 = vmatpush.msrb.mxu2 %v168_v24 }
 0x471   :  { %v527_v30 = vadd.f32 1e-07, %v523_v28 }
 0x474   :  { %v515_v27 = vpop.f32.mrf.mxu2 }
 0x475   :  { %v516_v52 = vadd.f32 %v515_v27, %v252_v26  ;;  %v165_v26 = vld [vmem:[%s1320_s4 + $0x500] sm:$0xff] }
 0x477   :  { %v524_v29 = vmax.f32 %v516_v52, 0.0 }
 0x479   :  { %v528_v31 = vadd.f32 1e-07, %v524_v29 }
 0x47b   :  { %v531_v32 = vmax.f32 %v527_v30, %v528_v31 }
 0x47c   :  { %v518_v58 = vpop.f32.mrf.mxu2 }
 0x47d   :  { %v519_v50 = vadd.f32 %v518_v58, %v255_v33 }
 0x47f   :  { %v525_v34 = vmax.f32 %v519_v50, 0.0 }
 0x481   :  { %v529_v37 = vadd.f32 1e-07, %v525_v34 }
 0x484   :  { %v520_v51 = vpop.f32.mrf.mxu2 }
 0x485   :  { %v521_v35 = vadd.f32 %v520_v51, %v258_v62 }
 0x487   :  { %v526_v36 = vmax.f32 %v521_v35, 0.0  ;;  %v596_v35 = vperm.slane %v949_v45, 7  ;;  %v194_v45 = vld [vmem:[%s1320_s4 + $0x6d0] sm:$0xff] }
 0x489   :  { %v530_v38 = vadd.f32 1e-07, %v526_v36 }
 0x48b   :  { %v532_v41 = vmax.f32 %v529_v37, %v530_v38 }
 0x48d   :  { %v533_v43 = vmax.f32 %v531_v32, %v532_v41 }
 0x48f   :  { %v534_v46 = vrot.slane %v533_v43, 4 }
 0x491   :  { %v535_v47 = vmax.f32 %v533_v43, %v534_v46  ;;  %v196_v46 = vld [vmem:[%s1320_s4 + $0x6f0] sm:$0xff] }
 0x492   :  { %662 = vmatpush.msrb.mxu3 %v196_v46 }
 0x493   :  { %v536_v54 = vrot.slane %v535_v47, 2 }
 0x495   :  { %v537_v56 = vmax.f32 %v535_v47, %v536_v54  ;;  %v195_v47 = vld [vmem:[%s1320_s4 + $0x6e0] sm:$0xff] }
 0x496   :  { %663 = vmatpush.msrb.mxu3 %v195_v47 }
 0x497   :  { %v538_v59 = vrot.slane %v537_v56, 1 }
 0x498   :  { %664 = vmatpush.msrb.mxu3 %v194_v45 }
 0x499   :  { %v539_v61 = vmax.f32 %v537_v56, %v538_v59 }
 0x49a   :  { %665 = vmatpush.msrb.mxu3 %v193_v49 }
 0x49b   :  { %v543_v42 = vsub.f32 %v530_v38, %v539_v61  ;;  %v542_v0 = vsub.f32 %v529_v37, %v539_v61  ;;  %v540_v1 = vsub.f32 %v527_v30, %v539_v61  ;;  %v541_v2 = vsub.f32 %v528_v31, %v539_v61 }
 0x49c   :  { %666 = vmatpush.msrb.mxu3 %v192_v55 }
 0x49d   :  { %v550_v4 = vmul.f32 1.442695, %v543_v42  ;;  %v548_v39 = vmul.f32 1.442695, %v542_v0  ;;  %v544_v5 = vmul.f32 1.442695, %v540_v1 }
 0x49e   :  { %v546_v6 = vmul.f32 1.442695, %v541_v2  ;;  %667 = vmatpush.msrb.mxu3 %v191_v57  ;;  %v189_v42 = vld [vmem:[%s1320_s4 + $0x680] sm:$0xff]  ;;  %v188_v2 = vld [vmem:[%s1320_s4 + $0x670] sm:$0xff] }
 0x49f   :  { %735 = vpow2.f32 %v550_v4  ;;  %v187_v4 = vld [vmem:[%s1320_s4 + $0x660] sm:$0xff] }
 0x4a0   :  { %737 = vpow2.f32 %v548_v39  ;;  %668 = vmatpush.msrb.mxu3 %v190_v60 }
 0x4a1   :  { %739 = vpow2.f32 %v544_v5  ;;  %v186_v5 = vld [vmem:[%s1320_s4 + $0x650] sm:$0xff] }
 0x4a2   :  { %741 = vpow2.f32 %v546_v6  ;;  %669 = vmatpush.msrb.mxu3 %v189_v42 }
 0x4a4   :  { %670 = vmatpush.msrb.mxu3 %v188_v2 }
 0x4a5   :  { %v736_v9 = vpop.eup %735 }
 0x4a6   :  { %v738_v10 = vpop.eup %737  ;;  %v555_v11 = vmul.f32 %v736_v9, %v530_v38  ;;  %671 = vmatpush.msrb.mxu3 %v187_v4 }
 0x4a7   :  { %v740_v13 = vpop.eup %739  ;;  %v558_v40 = vpack.c.bf16 %v736_v9, %v738_v10  ;;  %v554_v14 = vmul.f32 %v738_v10, %v529_v37  ;;  %v184_v9 = vld [vmem:[%s1320_s4 + $0x630] sm:$0xff]  ;;  %v183_v10 = vld [vmem:[%s1320_s4 + $0x620] sm:$0xff] }
 0x4a8   :  { %v742_v53 = vpop.eup %741  ;;  %v552_v15 = vmul.f32 %v740_v13, %v527_v30  ;;  %672 = vmatpush.msrb.mxu3 %v186_v5 }
 0x4a9   :  { %566 = vmatpush.bf16.msra.mxu0 %v558_v40  ;;  %v559_v16 = vpack.c.bf16 %v555_v11, %v554_v14  ;;  %v556_v17 = vpack.c.bf16 %v742_v53, %v740_v13  ;;  %v553_v18 = vmul.f32 %v742_v53, %v528_v31  ;;  %v182_v13 = vld [vmem:[%s1320_s4 + $0x610] sm:$0xff]  ;;  %v181_v14 = vld [vmem:[%s1320_s4 + $0x600] sm:$0xff] }
 0x4aa   :  { %673 = vmatpush.msrb.mxu3 %v185_v7 }
 0x4ab   :  { %580 = vmatpush.bf16.msra.mxu1 %v559_v16  ;;  %v557_v44 = vpack.c.bf16 %v553_v18, %v552_v15 }
 0x4ac   :  { %674 = vmatpush.msrb.mxu3 %v184_v9 }
 0x4ad   :  { %567 = vmatpush.bf16.msra.mxu0 %v556_v17 }
 0x4ae   :  { %675 = vmatpush.msrb.mxu3 %v183_v10 }
 0x4af   :  { %581 = vmatpush.bf16.msra.mxu1 %v557_v44 }
 0x4b0   :  { %711 = vmatmul.msk.bf16.vlgmr.msra.gmra.mxu0 %vm348_vm7, %v1012_v12  ;;  %676 = vmatpush.msrb.mxu3 %v182_v13 }
 0x4b2   :  { %712 = vmatmul.msk.bf16.vlgmr.msra.gmra.mxu1 %vm348_vm7, %v1012_v12  ;;  %v167_v12 = vld [vmem:[%s1320_s4 + $0x520] sm:$0xff]  ;;  %677 = vmatpush.msrb.mxu3 %v181_v14  ;;  %s777_s4 = smov [#allocation2]  }
 0x4b3   :  { %610 = vmatpush.msrb.mxu2 %v167_v12  ;;  %v653_v12 = vperm.slane %v199_v22, 0  ;;  %s691_s5 = sshll.u32 %s777_s4, 4  ;;  %s692_s5 = int_to_ptr.vmem [resolvable:$true] %s691_s5 }
 0x4b5   :  { %611 = vmatpush.msrb.mxu2 %v166_v25 }
 0x4b7   :  { %612 = vmatpush.msrb.mxu2 %v165_v26 }
 0x52d   :  { %v569_v27 = vpop.f32.mrf.mxu0 }
 0x52e   :  { %v588_v28 = vmax.f32 %v569_v27, 1e-16  ;;  %v656_v27 = vperm.slane %v199_v22, 1 }
 0x52f   :  { %v583_v52 = vpop.f32.mrf.mxu1 }
 0x530   :  { %743 = vrcp.f32 %v588_v28 }
 0x535   :  { %v571_v29 = vpop.f32.mrf.mxu0 }
 0x536   :  { %v744_v30 = vpop.eup %743  ;;  %v589_v31 = vmax.f32 %v571_v29, 1e-16 }
 0x537   :  { %v592_v32 = vmul.f32 %v744_v30, %v583_v52  ;;  %v585_v50 = vpop.f32.mrf.mxu1 }
 0x538   :  { %745 = vrcp.f32 %v589_v31 }
 0x539   :  { %v594_v58 = vadd.f32 %v592_v32, %v1194_v19 }
 0x53b   :  { %613 = vmatmul.f32.vlgmr.msrb.gmra.mxu2 %v594_v58 }
 0x53e   :  { %v746_v33 = vpop.eup %745 }
 0x53f   :  { %v593_v62 = vmul.f32 %v746_v33, %v585_v50  ;;  %v661_v33 = vperm.slane %v199_v22, 2 }
 0x541   :  { %v595_v51 = vadd.f32 %v593_v62, %v1196_v20 }
 0x543   :  { %616 = vmatmul.f32.gmra.mxu2 %v595_v51 }
 0x5be   :  { %v614_v34 = vpop.f32.mrf.mxu2 }
 0x5bf   :  { %v615_v37 = vadd.f32 %v614_v34, %v596_v35 }
 0x5c6   :  { %v617_v36 = vpop.f32.mrf.mxu2 }
 0x5c7   :  { %v618_v38 = vadd.f32 %v617_v36, %v596_v35 }
 0x5c9   :  { %v620_v41 = vadd.f32 %v618_v38, %v615_v37 }
 0x5cb   :  { %v621_v43 = vrot.slane %v620_v41, 4 }
 0x5cd   :  { %v622_v19 = vadd.f32 %v621_v43, %v620_v41 }
 0x5cf   :  { %v623_v20 = vrot.slane %v622_v19, 2 }
 0x5d1   :  { %v624_v48 = vadd.f32 %v623_v20, %v622_v19 }
 0x5d3   :  { %v625_v54 = vrot.slane %v624_v48, 1 }
 0x5d5   :  { %v626_v56 = vadd.f32 %v625_v54, %v624_v48 }
 0x5d7   :  { %v627_v59 = vmul.f32 0.0625, %v626_v56 }
 0x5d9   :  { %v628_v61 = vsub.f32 %v615_v37, %v627_v59  ;;  %v629_v63 = vsub.f32 %v618_v38, %v627_v59 }
 0x5db   :  { %v630_v0 = vmul.f32 %v628_v61, %v628_v61  ;;  %v631_v1 = vmul.f32 %v629_v63, %v629_v63 }
 0x5dd   :  { %v632_v3 = vadd.f32 %v631_v1, %v630_v0 }
 0x5df   :  { %v633_v39 = vrot.slane %v632_v3, 4 }
 0x5e1   :  { %v634_v6 = vadd.f32 %v633_v39, %v632_v3 }
 0x5e3   :  { %v635_v8 = vrot.slane %v634_v6, 2 }
 0x5e5   :  { %v636_v11 = vadd.f32 %v635_v8, %v634_v6 }
 0x5e7   :  { %v637_v40 = vrot.slane %v636_v11, 1 }
 0x5e9   :  { %v638_v53 = vadd.f32 %v637_v40, %v636_v11 }
 0x5eb   :  { %v639_v15 = vmul.f32 0.0625, %v638_v53 }
 0x5ed   :  { %v640_v16 = vadd.f32 1e-05, %v639_v15 }
 0x5ef   :  { %747 = vrsqrt.f32 %v640_v16  ;;  %vm647_vm12 = vweird.f32 %v640_v16 }
 0x5f5   :  { %v748_v17 = vpop.eup %747 }
 0x5f6   :  { %v642_v18 = vmul.f32 %v748_v17, %v640_v16  ;;  %vm648_vm11 = vweird.f32 %v748_v17 }
 0x5f7   :  { %vm649_vm13 = vmor %vm647_vm12, %vm648_vm11 }
 0x5f8   :  { %v643_v44 = vmul.f32 %v748_v17, %v642_v18 }
 0x5fa   :  { %v644_v21 = vmul.f32 0.5, %v643_v44 }
 0x5fc   :  { %v645_v23 = vsub.f32 1.5, %v644_v21 }
 0x5fe   :  { %v646_v24 = vmul.f32 %v748_v17, %v645_v23 }
 0x600   :  { %v650_v25 = vsel %vm649_vm13, %v748_v17, %v646_v24 }
 0x601   :  { %v651_v26 = vmul.f32 %v650_v25, %v628_v61  ;;  %v652_v28 = vmul.f32 %v650_v25, %v629_v63 }
 0x603   :  { %v654_v52 = vmul.f32 %v653_v12, %v651_v26  ;;  %v655_v31 = vmul.f32 %v653_v12, %v652_v28 }
 0x605   :  { %v657_v29 = vadd.f32 %v656_v27, %v654_v52  ;;  %v658_v32 = vadd.f32 %v656_v27, %v655_v31 }
 0x607   :  { %v659_v30 = vmax.f32 %v657_v29, 0.0  ;;  %v660_v58 = vmax.f32 %v658_v32, 0.0 }
 0x609   :  { %678 = vmatmul.f32.vlgmr.msrb.gmra.mxu3 %v659_v30 }
 0x611   :  { %681 = vmatmul.f32.gmra.mxu3 %v660_v58 }
 0x68c   :  { %v679_v50 = vpop.f32.mrf.mxu3 }
 0x68d   :  { %v680_v62 = vadd.f32 %v679_v50, %v661_v33 }
 0x68f   :  { %685 = vst [vmem:[#allocation2] sm:$0xff] %v680_v62 }
 0x694   :  { %v682_v51 = vpop.f32.mrf.mxu3 }
 0x695   :  { %v683_v34 = vadd.f32 %v682_v51, %v661_v33 }
 0x697   :  { %686 = vst [vmem:[#allocation2 + $0x8] sm:$0xff] %v683_v34 }
 0x698   :  { %699 = dma.vmem_to_hbm [thread:$0]  %s692_s5, 256, %s694_s10, [#allocation3], %s778_s11, %s778_s11, %s779_s12  }
 0x699   :  { %773 = dma.done.wait [#allocation3], 256  }
 0x69a   :  { %774 = vsyncadd [#allocation3], 4294967040 }
 0x69b   :  { %704 = vsyncpa [#allocation3], 1 }

</bundles_post_ra>
